<compile_context>
chip_gen: v5e
topology: v5e:2x2
jax: 0.10.0
libtpu: 0.0.40
codegen_flags: <defaults>
</compile_context>

<pallas_src>
import jax
import jax.numpy as jnp
from jax.experimental import pallas as pl
from jax.experimental.pallas import tpu as pltpu

# ---------------- config (what NGPNeuralField.__init__ implies) --------------
N_INPUT_DIMS = 3
N_OUTPUT_DIMS = 1

ENC_N_LEVELS = 8
ENC_F_PER_LEVEL = 2
ENC_LOG2_HASHMAP = 12
ENC_BASE_RES = 4
ENC_PER_LEVEL_SCALE = 1.5
ENC_DIMS = ENC_N_LEVELS * ENC_F_PER_LEVEL            # 16

MLP_HIDDEN = 64                                       # FullyFusedMLP n_neurons

TILE_N_MAX = 4096                                     # points per grid step (max)
TILE_N_MIN = 512                                      # keep lane dim a multiple of 128
MIN_GRID_STEPS = 4                                    # keep v7x megacore fed

_PRIMES = (1, 2654435761, 805459861)


def _choose_tile(n):
    """Pick the point-tile: as large as possible, but keep >= MIN_GRID_STEPS
    grid steps so the 'parallel' axis can split across both v7x TensorCores."""
    t = max(TILE_N_MIN, (n // MIN_GRID_STEPS) // TILE_N_MIN * TILE_N_MIN)
    return min(TILE_N_MAX, t)


# ------------------------------ Pallas kernel ---------------------------------
def _ngp_mlp_kernel(f_ref, w1t_ref, w2t_ref, w3_ref, out_ref):
    # f:   [16, TILE_N]  bf16  hash-grid features (channels on sublanes, points on lanes)
    # w1t: [64, 16] bf16, w2t: [64, 64] bf16, w3: [64, 1] f32
    # out: [1, TILE_N]   f32   lane-dense density-before-activation
    f = f_ref[...]
    h = jnp.dot(w1t_ref[...], f, preferred_element_type=jnp.float32)      # [64, TILE_N]
    h = jnp.maximum(h, 0.0)
    h = jnp.dot(w2t_ref[...], h.astype(jnp.bfloat16),
                preferred_element_type=jnp.float32)                        # [64, TILE_N]
    h = jnp.maximum(h, 0.0)
    # Final 64 -> 1 layer: VPU multiply + sublane (XLU) reduction instead of a
    # 64x1 MXU push; result is a lane-dense [1, TILE_N] row.
    out_ref[...] = jnp.sum(h * w3_ref[...], axis=0, keepdims=True)


# ------------------------------ Pallas wrapper --------------------------------
def ngp_mlp_pallas(feats_t, w1, w2, w3, tile_n):
    """feats_t: [16, n_pad] bf16 (n_pad % tile_n == 0) -> [1, n_pad] f32."""
    n_pad = feats_t.shape[1]
    assert n_pad % tile_n == 0
    w1t = w1.T.astype(jnp.bfloat16)            # [64, 16]
    w2t = w2.T.astype(jnp.bfloat16)            # [64, 64]
    w3f = w3.astype(jnp.float32)               # [64, 1]

    cost = pl.CostEstimate(
        flops=2 * n_pad * (ENC_DIMS * MLP_HIDDEN + MLP_HIDDEN * MLP_HIDDEN + MLP_HIDDEN),
        transcendentals=0,
        bytes_accessed=n_pad * (ENC_DIMS * 2 + 4)
        + 2 * (ENC_DIMS * MLP_HIDDEN + MLP_HIDDEN * MLP_HIDDEN)
        + 4 * MLP_HIDDEN,
    )

    out = pl.pallas_call(
        _ngp_mlp_kernel,
        out_shape=jax.ShapeDtypeStruct((1, n_pad), jnp.float32),
        grid=(n_pad // tile_n,),
        in_specs=[
            pl.BlockSpec((ENC_DIMS, tile_n), lambda i: (0, i)),
            pl.BlockSpec((MLP_HIDDEN, ENC_DIMS), lambda i: (0, 0)),
            pl.BlockSpec((MLP_HIDDEN, MLP_HIDDEN), lambda i: (0, 0)),
            pl.BlockSpec((MLP_HIDDEN, N_OUTPUT_DIMS), lambda i: (0, 0)),
        ],
        out_specs=pl.BlockSpec((1, tile_n), lambda i: (0, i)),
        compiler_params=pltpu.CompilerParams(
            dimension_semantics=("parallel",),
            vmem_limit_bytes=64 << 20),
        cost_estimate=cost,
    )(feats_t, w1t, w2t, w3f)
    return out                                  # [1, n_pad]


# --------------------- plain-JAX glue: normalize + hash grid -------------------
def normalize_positions(positions, aabb, recon_origin):
    aabb_min, aabb_max = aabb[:N_INPUT_DIMS], aabb[N_INPUT_DIMS:]
    x = positions - recon_origin.reshape(1, N_INPUT_DIMS)
    return (x - aabb_min[None, :]) / (aabb_max - aabb_min)[None, :]


def hash_encode_t(x_t, tables_t):
    """Multi-resolution hash-grid encoding in the kernel's transposed layout.

    x_t: [3, N] unit-cube coords; tables_t: [L, F, T].  Returns [16, N] bf16
    (each level accumulated as a [F, N] slab, concatenated on axis 0, cast once).
    """
    # TODO(synk): data-dependent hash-table gather kept in plain JAX (no clean
    # Pallas/Mosaic gather equivalent for this access pattern).
    n = x_t.shape[1]
    t_size = tables_t.shape[2]
    p0 = jnp.uint32(_PRIMES[0])
    p1 = jnp.uint32(_PRIMES[1])
    p2 = jnp.uint32(_PRIMES[2])
    slabs = []
    for lvl in range(ENC_N_LEVELS):
        scale = ENC_BASE_RES * (ENC_PER_LEVEL_SCALE ** lvl) - 1.0
        pos = x_t * scale + 0.5                              # [3, N]
        pos0f = jnp.floor(pos)
        w = pos - pos0f                                      # [3, N]
        pos0 = pos0f.astype(jnp.int32).astype(jnp.uint32)    # [3, N]
        acc = jnp.zeros((ENC_F_PER_LEVEL, n), jnp.float32)
        for corner in range(8):
            ox, oy, oz = (corner >> 0) & 1, (corner >> 1) & 1, (corner >> 2) & 1
            c0 = pos0[0] + jnp.uint32(ox)
            c1 = pos0[1] + jnp.uint32(oy)
            c2 = pos0[2] + jnp.uint32(oz)
            idx = (c0 * p0) ^ (c1 * p1) ^ (c2 * p2)
            idx = (idx & jnp.uint32(t_size - 1)).astype(jnp.int32)
            cf = jnp.take(tables_t[lvl], idx, axis=1)        # gather [F, N]
            wx = w[0] if ox else (1.0 - w[0])
            wy = w[1] if oy else (1.0 - w[1])
            wz = w[2] if oz else (1.0 - w[2])
            wc = (wx * wy * wz)[None, :]                     # [1, N]
            acc = acc + wc * cf
        slabs.append(acc)
    return jnp.concatenate(slabs, axis=0).astype(jnp.bfloat16)   # [16, N]


def hash_encode(x, tables):
    """Row-major f32 encode (used only by the pure-JAX references)."""
    n = x.shape[0]
    t_size = tables.shape[1]
    primes = jnp.array(_PRIMES, dtype=jnp.uint32)
    level_feats = []
    for lvl in range(ENC_N_LEVELS):
        scale = ENC_BASE_RES * (ENC_PER_LEVEL_SCALE ** lvl) - 1.0
        pos = x * scale + 0.5
        pos0f = jnp.floor(pos)
        w = pos - pos0f
        pos0 = pos0f.astype(jnp.int32).astype(jnp.uint32)
        acc = jnp.zeros((n, ENC_F_PER_LEVEL), dtype=jnp.float32)
        for corner in range(8):
            offs = jnp.array([(corner >> d) & 1 for d in range(3)], dtype=jnp.uint32)
            c = pos0 + offs[None, :]
            idx = (c[:, 0] * primes[0]) ^ (c[:, 1] * primes[1]) ^ (c[:, 2] * primes[2])
            idx = (idx & jnp.uint32(t_size - 1)).astype(jnp.int32)
            cf = tables[lvl][idx]                                  # gather [N, F]
            offs_f = offs.astype(jnp.float32)[None, :]
            wc = jnp.prod(offs_f * w + (1.0 - offs_f) * (1.0 - w),
                          axis=-1, keepdims=True)
            acc = acc + wc * cf
        level_feats.append(acc)
    return jnp.concatenate(level_feats, axis=-1)                   # [N, 16]


# --------------------------------- forward ------------------------------------
def ngp_forward(positions, aabb, recon_origin, tables, w1, w2, w3, *, tile_n=None):
    """positions: [N, 3] -> [1, N, 1] (matches the PyTorch broadcasting)."""
    n = positions.shape[0]
    if tile_n is None:
        tile_n = _choose_tile(n)
    n_pad = pl.cdiv(n, tile_n) * tile_n

    x = normalize_positions(positions, aabb, recon_origin)          # [N, 3]
    sel = jnp.all((x > 0.0) & (x < 1.0), axis=-1).astype(jnp.float32)  # [N]

    # Pad only the tiny [3, N] position tensor; the encode emits features
    # directly in the kernel's [16, n_pad] bf16 layout (no extra HBM round trip).
    x_t = jnp.pad(x.T, ((0, 0), (0, n_pad - n)))                    # [3, n_pad]
    tables_t = jnp.swapaxes(tables, 1, 2)                           # [L, F, T]
    feats_t = hash_encode_t(x_t, tables_t)                          # [16, n_pad] bf16

    o = ngp_mlp_pallas(feats_t, w1, w2, w3, tile_n)[0, :n]          # [N]
    # relu(o * sel) == relu(o) * sel  because sel in {0, 1}
    return (jnp.maximum(o, 0.0) * sel)[None, :, None]               # [1, N, 1]


# ------------------------------ JAX references ---------------------------------
def ngp_forward_ref(positions, aabb, recon_origin, tables, w1, w2, w3):
    """Pure-f32 module-semantics reference."""
    x = normalize_positions(positions, aabb, recon_origin)
    feats = hash_encode(x, tables)
    h = jnp.maximum(feats @ w1, 0.0)
    h = jnp.maximum(h @ w2, 0.0)
    o = h @ w3
    sel = jnp.all((x > 0.0) & (x < 1.0), axis=-1,
                  keepdims=True).astype(jnp.float32)
    return jnp.maximum(o * sel, 0.0)[None]


def ngp_forward_ref_bf16(positions, aabb, recon_origin, tables, w1, w2, w3):
    """Precision-matched reference (bf16 MXU inputs, f32 accumulation)."""
    x = normalize_positions(positions, aabb, recon_origin)
    feats = hash_encode(x, tables)
    h = jnp.maximum(jnp.dot(feats.astype(jnp.bfloat16), w1.astype(jnp.bfloat16),
                            preferred_element_type=jnp.float32), 0.0)
    h = jnp.maximum(jnp.dot(h.astype(jnp.bfloat16), w2.astype(jnp.bfloat16),
                            preferred_element_type=jnp.float32), 0.0)
    o = (h @ w3.astype(jnp.float32))[:, 0]
    sel = jnp.all((x > 0.0) & (x < 1.0), axis=-1).astype(o.dtype)
    return (jnp.maximum(o, 0.0) * sel)[None, :, None]


# ----------------------------------- main --------------------------------------
if __name__ == "__main__":
    key = jax.random.PRNGKey(0)
    k_pos, k_tab, k_w1, k_w2, k_w3 = jax.random.split(key, 5)

    # N deliberately NOT a multiple of the tile: exercises padding and multiple
    # grid steps (tile chooser picks 512 here -> 5-step grid).
    N = 2500
    positions = jax.random.uniform(k_pos, (N, N_INPUT_DIMS), jnp.float32,
                                   minval=-1.2, maxval=1.2)

    # buffers from __init__
    aabb = jnp.array([-1.0, -1.0, -1.0, 1.0, 1.0, 1.0], dtype=jnp.float32)
    recon_origin = jnp.array([[[0.05, -0.03, 0.02]]], dtype=jnp.float32)   # [1,1,3]

    # deterministic parameter init (shapes implied by the config above)
    tables = jax.random.uniform(
        k_tab, (ENC_N_LEVELS, 2 ** ENC_LOG2_HASHMAP, ENC_F_PER_LEVEL),
        jnp.float32, minval=-1e-4, maxval=1e-4)
    w1 = jax.random.normal(k_w1, (ENC_DIMS, MLP_HIDDEN), jnp.float32) * \
        (2.0 / ENC_DIMS) ** 0.5
    w2 = jax.random.normal(k_w2, (MLP_HIDDEN, MLP_HIDDEN), jnp.float32) * \
        (2.0 / MLP_HIDDEN) ** 0.5
    w3 = jax.random.normal(k_w3, (MLP_HIDDEN, N_OUTPUT_DIMS), jnp.float32) * \
        (2.0 / MLP_HIDDEN) ** 0.5

    out = jax.block_until_ready(
        jax.jit(ngp_forward)(positions, aabb, recon_origin, tables, w1, w2, w3))
    assert out.shape == (1, N, N_OUTPUT_DIMS), out.shape

    # Kernel-correctness gate: precision-matched reference (only accumulation-order
    # level differences remain).
    ref_bf16 = jax.block_until_ready(
        ngp_forward_ref_bf16(positions, aabb, recon_origin, tables, w1, w2, w3))
    assert jnp.allclose(out, ref_bf16, atol=1e-6, rtol=1e-3), \
        float(jnp.max(jnp.abs(out - ref_bf16)))

    # Semantic sanity vs. the full-f32 module reference (difference = bf16 input
    # quantization of the MXU operands only).
    ref_f32 = jax.block_until_ready(
        ngp_forward_ref(positions, aabb, recon_origin, tables, w1, w2, w3))
    err = float(jnp.max(jnp.abs(out - ref_f32)))
    scale = float(jnp.max(jnp.abs(ref_f32)))
    assert err <= 0.1 * scale + 1e-6, (err, scale)

    print("KERNEL_OK")
</pallas_src>

<mosaic_0001>
module attributes {stable_mosaic.version = 11 : i64} {
  func.func @_ngp_mlp_kernel(%arg0: i32, %arg1: memref<16x512xbf16, #tpu.memory_space<vmem>>, %arg2: memref<64x16xbf16, #tpu.memory_space<vmem>>, %arg3: memref<64x64xbf16, #tpu.memory_space<vmem>>, %arg4: memref<64x1xf32, #tpu.memory_space<vmem>>, %arg5: memref<1x512xf32, #tpu.memory_space<vmem>>) attributes {dimension_semantics = [#tpu.dimension_semantics<parallel>], iteration_bounds = array<i64: 5>, scalar_prefetch = 0 : i64, scratch_operands = 0 : i64, tpu.core_type = #tpu.core_type<tc>, window_params = [{transform_indices = @transform_0, window_bounds = array<i64: 16, 512>}, {pipeline_mode = #tpu.pipeline_mode<synchronous>, transform_indices = @transform_1, window_bounds = array<i64: 64, 16>}, {pipeline_mode = #tpu.pipeline_mode<synchronous>, transform_indices = @transform_2, window_bounds = array<i64: 64, 64>}, {pipeline_mode = #tpu.pipeline_mode<synchronous>, transform_indices = @transform_3, window_bounds = array<i64: 64, 1>}, {transform_indices = @transform_4, window_bounds = array<i64: 1, 512>}]} {
    %c0 = arith.constant 0 : index
    %c0_0 = arith.constant 0 : index
    %0 = vector.load %arg1[%c0, %c0_0] : memref<16x512xbf16, #tpu.memory_space<vmem>>, vector<16x512xbf16>
    %c0_1 = arith.constant 0 : index
    %c0_2 = arith.constant 0 : index
    %1 = vector.load %arg2[%c0_1, %c0_2] : memref<64x16xbf16, #tpu.memory_space<vmem>>, vector<64x16xbf16>
    %cst = arith.constant dense<0.000000e+00> : vector<64x512xf32>
    %2 = tpu.matmul %1, %0, %cst {dimension_numbers = #tpu.dot_dimension_numbers<[1], [0], [0], [1], [0, 0, 1, 1], [], []>} : vector<64x16xbf16>, vector<16x512xbf16>, vector<64x512xf32> -> vector<64x512xf32>
    %cst_3 = arith.constant 0.000000e+00 : f32
    %3 = vector.broadcast %cst_3 : f32 to vector<64x512xf32>
    %4 = arith.maximumf %2, %3 : vector<64x512xf32>
    %c0_4 = arith.constant 0 : index
    %c0_5 = arith.constant 0 : index
    %5 = vector.load %arg3[%c0_4, %c0_5] : memref<64x64xbf16, #tpu.memory_space<vmem>>, vector<64x64xbf16>
    %6 = arith.truncf %4 : vector<64x512xf32> to vector<64x512xbf16>
    %cst_6 = arith.constant dense<0.000000e+00> : vector<64x512xf32>
    %7 = tpu.matmul %5, %6, %cst_6 {dimension_numbers = #tpu.dot_dimension_numbers<[1], [0], [0], [1], [0, 0, 1, 1], [], []>} : vector<64x64xbf16>, vector<64x512xbf16>, vector<64x512xf32> -> vector<64x512xf32>
    %cst_7 = arith.constant 0.000000e+00 : f32
    %8 = vector.broadcast %cst_7 : f32 to vector<64x512xf32>
    %9 = arith.maximumf %7, %8 : vector<64x512xf32>
    %c0_8 = arith.constant 0 : index
    %c0_9 = arith.constant 0 : index
    %10 = vector.load %arg4[%c0_8, %c0_9] : memref<64x1xf32, #tpu.memory_space<vmem>>, vector<64x1xf32>
    %11 = vector.broadcast %10 : vector<64x1xf32> to vector<64x512xf32>
    %12 = arith.mulf %9, %11 : vector<64x512xf32>
    %cst_10 = arith.constant dense<0.000000e+00> : vector<512xf32>
    %13 = vector.multi_reduction <add>, %12, %cst_10 [0] : vector<64x512xf32> to vector<512xf32>
    %14 = vector.shape_cast %13 : vector<512xf32> to vector<1x512xf32>
    %c0_11 = arith.constant 0 : index
    %c0_12 = arith.constant 0 : index
    %15 = vector.load %arg5[%c0_11, %c0_12] : memref<1x512xf32, #tpu.memory_space<vmem>>, vector<1x512xf32>
    tpu.vector_store %arg5[%c0_11, %c0_12], %14 {strides = array<i32>} : memref<1x512xf32, #tpu.memory_space<vmem>>, vector<1x512xf32>,
    return
  }
  func.func @transform_0(%arg0: i32) -> (i32, i32) {
    %c0_i32 = arith.constant 0 : i32
    %c0_i32_0 = arith.constant 0 : i32
    return %c0_i32, %arg0 : i32, i32
  }
  func.func @transform_1(%arg0: i32) -> (i32, i32) {
    %c0_i32 = arith.constant 0 : i32
    %c0_i32_0 = arith.constant 0 : i32
    %c0_i32_1 = arith.constant 0 : i32
    return %c0_i32, %c0_i32_0 : i32, i32
  }
  func.func @transform_2(%arg0: i32) -> (i32, i32) {
    %c0_i32 = arith.constant 0 : i32
    %c0_i32_0 = arith.constant 0 : i32
    %c0_i32_1 = arith.constant 0 : i32
    return %c0_i32, %c0_i32_0 : i32, i32
  }
  func.func @transform_3(%arg0: i32) -> (i32, i32) {
    %c0_i32 = arith.constant 0 : i32
    %c0_i32_0 = arith.constant 0 : i32
    %c0_i32_1 = arith.constant 0 : i32
    return %c0_i32, %c0_i32_0 : i32, i32
  }
  func.func @transform_4(%arg0: i32) -> (i32, i32) {
    %c0_i32 = arith.constant 0 : i32
    %c0_i32_0 = arith.constant 0 : i32
    return %c0_i32, %arg0 : i32, i32
  }
}

</mosaic_0001>

<bundles_post_ra>
// kernel: ngp_forward.1
= control target key start
LH: loop header
LB: loop body
LE: loop exit
PB: predicated region body
PF: predicated region fallthrough
CT: control target
= control target key end

     0   :  { %s1033_s15 = smov 0   ;;  %s1035_s16 = smov 0   ;;  %s1264_s0 = inlined_call_operand.vmem [shape: bf16[16,2560], index: 0, kind: input, shape index: {}]   ;;  %s1265_s1 = inlined_call_operand.vmem [shape: bf16[64,16], index: 1, kind: input, shape index: {}]   ;;  %s1266_s2 = inlined_call_operand.vmem [shape: bf16[64,64], index: 2, kind: input, shape index: {}]   ;;  %s1267_s3 = inlined_call_operand.vmem [shape: f32[64,1], index: 3, kind: input, shape index: {}]   ;;  %s1268_s4 = inlined_call_operand.vmem [shape: f32[1,2560], index: 4, kind: output, shape index: {}]  }
   0x1   :  { %s1037_s17 = smov 0  }
   0x2 LB: > { %s850_s18 = sadd.s32 4294967295, %s1005_s17   ;;  %s1050_s19 = sadd.s32 1, %s1005_s17   ;;  %s1005_s17 = sphi %s1037_s17, %s1271_s17   ;;  %s1001_s16 = sphi %s1035_s16, %s1270_s16   ;;  %s997_s15 = sphi %s1033_s15, %s1269_s15  }
   0x3   : > { %s18_s20 = ssub.s32 %s1005_s17, %s1050_s19  ;;  %s21_s21 = sadd.s32 1, %s1001_s16 }
   0x4   : > { %p19_p0 = scmp.eq.s32.totalorder %s18_s20, 0  ;;  %p28_p1 = scmp.ne.s32.totalorder %s1001_s16, %s997_s15 }
   0x5   : > { %p29_p2 = scmp.eq.s32.totalorder %s1005_s17, 0  ;;  %p853_p4 = scmp.ge.s32.totalorder %s1005_s17, 5 }
   0x6   : > { %s1059_s22 = scalar_select %p19_p0, %s1001_s16, %s21_s21  }
   0x7   : > { %p30_p3 = por %p29_p2, %p28_p1  ;;  %152 = sbr.rel (%p853_p4) target bundleno = 20 (0x14), region = 28 }
   0xc   : > { %155 = sbr.rel (!%p30_p3) target bundleno = 20 (0x14), region = 32  ;;  %s157_s23 = sand.u32 (%p30_p3), 1, %s1001_s16  }
   0xd   : > { %s942_s24 = sshll.u32 (%p30_p3), %s1005_s17, 4  ;;  %s854_s25 = sshll.u32 (%p30_p3), %s157_s23, 5 }
   0xe   : > { %s162_s28 = scalar_lea.vmem (%p30_p3), %s1264_s0, %s942_s24  ;;  %s159_s29 = scalar_lea.vmem (%p30_p3), [#allocation2], %s854_s25 }
   0xf   : > { %v175_v0 = vld [vmem:[%s162_s28] sm:$0xff] (%p30_p3)  ;;  %v177_v1 = vld [vmem:[%s162_s28 + $0x8] sm:$0xff] (%p30_p3)  ;;  %v179_v2 = vld [vmem:[%s162_s28 + $0x50] sm:$0xff] (%p30_p3) }
  0x10   : > { %176 = vst [vmem:[%s159_s29] sm:$0xff] (%p30_p3), %v175_v0  ;;  %v181_v3 = vld [vmem:[%s162_s28 + $0x58] sm:$0xff] (%p30_p3) }
  0x11   : > { %178 = vst [vmem:[%s159_s29 + $0x8] sm:$0xff] %v177_v1 }
  0x12   : > { %180 = vst [vmem:[%s159_s29 + $0x10] sm:$0xff] %v179_v2 }
  0x13   : > { %182 = vst [vmem:[%s159_s29 + $0x18] sm:$0xff] %v181_v3 }
  0x14 PF: > { %p857_p5 = scmp.ge.s32.totalorder %s1005_s17, 1  ;;  %p187_p6 = scmp.lt.s32.totalorder %s1005_s17, 6 }
  0x16   : > { %p188_p7 = pnand %p857_p5, %p187_p6 }
  0x17   : > { %s194_s30 = sand.u32 (!%p188_p7), 1, %s997_s15   ;;  %s859_s23 = sshll.u32 (!%p188_p7), %s850_s18, 2 }
  0x18   : > { %191 = sbr.rel (%p188_p7) target bundleno = 455 (0x1c7), region = 55  ;;  %s858_s5 = sshll.u32 (!%p188_p7), %s194_s30, 5 }
  0x19   : > { %s196_s6 = scalar_lea.vmem (!%p188_p7), [#allocation2], %s858_s5  ;;  %p220_p8 = scmp.lt.s32.totalorder (!%p188_p7), %s859_s23, 19 }
  0x1d   : > { %v878_v4 = vld [vmem:[%s196_s6] sm:$0xf]  ;;  %v945_v5 = vld [vmem:[%s196_s6 + $0xc] sm:$0xf0]  ;;  %v943_v6 = vld [vmem:[%s196_s6 + $0x4] sm:$0xf] }
  0x1e   : > { %v879_v7 = vor.u32 %v945_v5, %v878_v4  ;;  %v880_v8 = vld [vmem:[%s196_s6 + $0x10] sm:$0xf0]  ;;  %v886_v9 = vld [vmem:[%s196_s6 + $0x8] sm:$0xf]  ;;  %v946_v10 = vld [vmem:[%s196_s6 + $0x14] sm:$0xf0] }
  0x1f   : > { %v883_v11 = vor.u32 %v943_v6, %v880_v8  ;;  %v887_v12 = vor.u32 %v946_v10, %v886_v9  ;;  %v944_v13 = vld [vmem:[%s196_s6 + $0xc] sm:$0xf]  ;;  %v888_v14 = vld [vmem:[%s196_s6 + $0x18] sm:$0xf0]  ;;  %v947_v15 = vld [vmem:[%s1265_s1] sm:$0xff]  ;;  %vm277_vm0 = vcmask 130048  }
  0x20   : > { %297 = vmatpush.bf16.msra.mxu0 %v879_v7  ;;  %v891_v16 = vor.u32 %v944_v13, %v888_v14  ;;  %v948_v17 = vld [vmem:[%s1265_s1 + $0x8] sm:$0xff]  ;;  %v949_v18 = vld [vmem:[%s1265_s1 + $0x10] sm:$0xff]  ;;  %v950_v19 = vld [vmem:[%s1265_s1 + $0x18] sm:$0xff]  ;;  %v1007_v60 = vmov 0   ;;  %vm482_vm1 = vcmask 523264   ;;  %s1273_s23 = smov (!%p220_p8, %s859_s23), 19 }
  0x21   : > { %326 = vmatpush.bf16.msra.mxu1 %v883_v11  ;;  %355 = vmatpush.bf16.msra.mxu2 %v887_v12  ;;  %v643_v61 = vld [vmem:[%s1267_s3] sm:$0xff]  ;;  %vm784_vm2 = vcmask 1042434   ;;  %vm782_vm3 = vcmask 1040384   ;;  %vm786_vm4 = vcmask 1041408   ;;  %s222_s24 = scalar_lea.vmem %s1268_s4, %s1273_s23 }
  0x22   : > { %384 = vmatpush.bf16.msra.mxu3 %v891_v16  ;;  %980 = vset.pattern.permute.xlu0 %v1007_v60 }
  0x23   : > { %892 = vmatmul.msk.bf16.vlgmr.msra.gmra.mxu0 %vm277_vm0, %v947_v15  ;;  %653 = vperm.xlu0 %980, %v643_v61  }
  0x24   : > { %896 = vmatmul.msk.bf16.vlgmr.msra.gmra.mxu1 %vm277_vm0, %v947_v15  ;;  %900 = vmatmul.msk.bf16.vlgmr.msra.gmra.mxu2 %vm277_vm0, %v947_v15 }
  0x25   : > { %904 = vmatmul.msk.bf16.vlgmr.msra.gmra.mxu3 %vm277_vm0, %v947_v15  ;;  %981 = vset.pattern.permute.xlu1 %v1007_v60 }
  0x26   : > { %982 = vset.pattern.permute.xlu2 %v1007_v60 }
  0x33   : > { %893 = vmatmul.msk.bf16.gmra.mxu0 %vm277_vm0, %v948_v17 }
  0x34   : > { %897 = vmatmul.msk.bf16.gmra.mxu1 %vm277_vm0, %v948_v17  ;;  %901 = vmatmul.msk.bf16.gmra.mxu2 %vm277_vm0, %v948_v17 }
  0x35   : > { %905 = vmatmul.msk.bf16.gmra.mxu3 %vm277_vm0, %v948_v17 }
  0x43   : > { %894 = vmatmul.msk.bf16.gmra.mxu0 %vm277_vm0, %v949_v18 }
  0x44   : > { %898 = vmatmul.msk.bf16.gmra.mxu1 %vm277_vm0, %v949_v18  ;;  %902 = vmatmul.msk.bf16.gmra.mxu2 %vm277_vm0, %v949_v18 }
  0x45   : > { %906 = vmatmul.msk.bf16.gmra.mxu3 %vm277_vm0, %v949_v18 }
  0x53   : > { %895 = vmatmul.msk.bf16.gmra.mxu0 %vm277_vm0, %v950_v19 }
  0x54   : > { %899 = vmatmul.msk.bf16.gmra.mxu1 %vm277_vm0, %v950_v19  ;;  %903 = vmatmul.msk.bf16.gmra.mxu2 %vm277_vm0, %v950_v19 }
  0x55   : > { %907 = vmatmul.msk.bf16.gmra.mxu3 %vm277_vm0, %v950_v19 }
  0xa0   : > { %v1098_v20 = vpop.f32.mrf.mxu0 }
  0xa1   : > { %v1100_v21 = vpop.f32.mrf.mxu1  ;;  %v406_v10 = vmax.f32 %v1098_v20, 0.0 }
  0xa2   : > { %v407_v17 = vmax.f32 %v1100_v21, 0.0 }
  0xa7   : > { %v1102_v22 = vpop.f32.mrf.mxu2 }
  0xa8   : > { %v1104_v23 = vpop.f32.mrf.mxu3  ;;  %v1106_v24 = vpop.f32.mrf.mxu0 }
  0xa9   : > { %v1108_v25 = vpop.f32.mrf.mxu1  ;;  %v410_v13 = vmax.f32 %v1106_v24, 0.0  ;;  %v644_v24 = vld [vmem:[%s1267_s3 + $0x8] sm:$0xff] }
  0xaa   : > { %v411_v18 = vmax.f32 %v1108_v25, 0.0  ;;  %658 = vperm.xlu0 %980, %v644_v24  }
  0xaf   : > { %v1110_v26 = vpop.f32.mrf.mxu2 }
  0xb0   : > { %v1112_v27 = vpop.f32.mrf.mxu3  ;;  %v304_v28 = vpop.f32.mrf.mxu0 }
  0xb1   : > { %v1114_v29 = vpop.f32.mrf.mxu1  ;;  %v414_v62 = vmax.f32 %v304_v28, 0.0 }
  0xb2   : > { %v415_v63 = vmax.f32 %v1114_v29, 0.0 }
  0xb7   : > { %v1116_v30 = vpop.f32.mrf.mxu2 }
  0xb8   : > { %v1118_v31 = vpop.f32.mrf.mxu3  ;;  %v306_v32 = vpop.f32.mrf.mxu0  ;;  %v416_v25 = vmax.f32 %v1116_v30, 0.0  ;;  %v413_v30 = vmax.f32 %v1112_v27, 0.0  ;;  %v646_v27 = vld [vmem:[%s1267_s3 + $0x18] sm:$0xff] }
  0xb9   : > { %v335_v33 = vpop.f32.mrf.mxu1  ;;  %v418_v0 = vmax.f32 %v306_v32, 0.0 }
  0xba   : > { %v419_v3 = vmax.f32 %v335_v33, 0.0 }
  0xbb   : > { %v450_v16 = vpack.c.bf16 %v418_v0, %v414_v62 }
  0xbc   : > { %v451_v28 = vpack.c.bf16 %v419_v3, %v415_v63 }
  0xbf   : > { %v1120_v34 = vpop.f32.mrf.mxu2 }
  0xc0   : > { %v1122_v35 = vpop.f32.mrf.mxu3  ;;  %v309_v36 = vpop.f32.mrf.mxu0  ;;  %v420_v20 = vmax.f32 %v1120_v34, 0.0  ;;  %v417_v34 = vmax.f32 %v1118_v31, 0.0  ;;  %v409_v31 = vmax.f32 %v1104_v23, 0.0  ;;  %v649_v23 = vld [vmem:[%s1267_s3 + $0x30] sm:$0xff] }
  0xc1   : > { %v338_v37 = vpop.f32.mrf.mxu1  ;;  %v422_v54 = vmax.f32 %v309_v36, 0.0  ;;  %v421_v33 = vmax.f32 %v1122_v35, 0.0  ;;  %v446_v36 = vpack.c.bf16 %v410_v13, %v406_v10  ;;  %683 = vperm.xlu0 %980, %v649_v23  }
  0xc2   : > { %v423_v57 = vmax.f32 %v338_v37, 0.0  ;;  %v447_v37 = vpack.c.bf16 %v411_v18, %v407_v17  ;;  %v452_v35 = vpack.c.bf16 %v420_v20, %v416_v25 }
  0xc7   : > { %v367_v38 = vpop.f32.mrf.mxu2 }
  0xc8   : > { %v1124_v39 = vpop.f32.mrf.mxu3  ;;  %v311_v40 = vpop.f32.mrf.mxu0  ;;  %v424_v19 = vmax.f32 %v367_v38, 0.0  ;;  %v951_v38 = vld [vmem:[%s1266_s2] sm:$0xff] }
  0xc9   : > { %v340_v41 = vpop.f32.mrf.mxu1  ;;  %v426_v55 = vmax.f32 %v311_v40, 0.0  ;;  %v425_v29 = vmax.f32 %v1124_v39, 0.0  ;;  %v412_v39 = vmax.f32 %v1110_v26, 0.0  ;;  %v645_v40 = vld [vmem:[%s1267_s3 + $0x10] sm:$0xff] }
  0xca   : > { %v427_v58 = vmax.f32 %v340_v41, 0.0  ;;  %v453_v41 = vpack.c.bf16 %v421_v33, %v417_v34  ;;  %663 = vperm.xlu1 %981, %v645_v40  }
  0xcb   : > { %v454_v2 = vpack.c.bf16 %v426_v55, %v422_v54 }
  0xcc   : > { %v455_v7 = vpack.c.bf16 %v427_v58, %v423_v57 }
  0xcf   : > { %v369_v42 = vpop.f32.mrf.mxu2 }
  0xd0   : > { %v398_v43 = vpop.f32.mrf.mxu3  ;;  %v314_v44 = vpop.f32.mrf.mxu0  ;;  %v428_v11 = vmax.f32 %v369_v42, 0.0  ;;  %v408_v42 = vmax.f32 %v1102_v22, 0.0  ;;  %v952_v22 = vld [vmem:[%s1266_s2 + $0x8] sm:$0xff] }
  0xd1   : > { %v343_v45 = vpop.f32.mrf.mxu1  ;;  %v430_v46 = vmax.f32 %v314_v44, 0.0  ;;  %v429_v14 = vmax.f32 %v398_v43, 0.0  ;;  %v449_v43 = vpack.c.bf16 %v413_v30, %v409_v31  ;;  %v650_v44 = vld [vmem:[%s1267_s3 + $0x38] sm:$0xff] }
  0xd2   : > { %v431_v48 = vmax.f32 %v343_v45, 0.0  ;;  %v456_v32 = vpack.c.bf16 %v428_v11, %v424_v19  ;;  %v448_v26 = vpack.c.bf16 %v412_v39, %v408_v42  ;;  %668 = vperm.xlu1 %981, %v646_v27   ;;  %v647_v45 = vld [vmem:[%s1267_s3 + $0x20] sm:$0xff] }
  0xd3   : > { %v457_v21 = vpack.c.bf16 %v429_v14, %v425_v29  ;;  %673 = vperm.xlu2 %982, %v647_v45  }
  0xd7   : > { %v372_v47 = vpop.f32.mrf.mxu2 }
  0xd8   : > { %v401_v49 = vpop.f32.mrf.mxu3  ;;  %v316_v50 = vpop.f32.mrf.mxu0  ;;  %v432_v4 = vmax.f32 %v372_v47, 0.0  ;;  %v648_v47 = vld [vmem:[%s1267_s3 + $0x28] sm:$0xff] }
  0xd9   : > { %v434_v51 = vmax.f32 %v316_v50, 0.0  ;;  %v345_v52 = vpop.f32.mrf.mxu1  ;;  %v433_v8 = vmax.f32 %v401_v49, 0.0 }
  0xda   : > { %v435_v53 = vmax.f32 %v345_v52, 0.0  ;;  %688 = vperm.xlu1 %981, %v650_v44  }
  0xdb   : > { %v458_v56 = vpack.c.bf16 %v434_v51, %v430_v46  ;;  %v953_v46 = vld [vmem:[%s1266_s2 + $0x10] sm:$0xff]  ;;  %678 = vperm.xlu2 %982, %v648_v47  }
  0xdc   : > { %v459_v59 = vpack.c.bf16 %v435_v53, %v431_v48  ;;  %v954_v48 = vld [vmem:[%s1266_s2 + $0x18] sm:$0xff] }
  0xdd   : > { %499 = vmatpush.bf16.msrb.mxu0 %v458_v56 }
  0xde   : > { %528 = vmatpush.bf16.msrb.mxu1 %v459_v59 }
  0xdf   : > { %v374_v1 = vpop.f32.mrf.mxu2 }
  0xe0   : > { %v436_v5 = vmax.f32 %v374_v1, 0.0  ;;  %v403_v6 = vpop.f32.mrf.mxu3  ;;  %v654_v1 = vpop.permute.xlu0 %653 }
  0xe1   : > { %v437_v9 = vmax.f32 %v403_v6, 0.0  ;;  %500 = vmatpush.bf16.msrb.mxu0 %v454_v2 }
  0xe2   : > { %529 = vmatpush.bf16.msrb.mxu1 %v455_v7  ;;  %v460_v12 = vpack.c.bf16 %v436_v5, %v432_v4 }
  0xe3   : > { %v461_v15 = vpack.c.bf16 %v437_v9, %v433_v8 }
  0xe4   : > { %557 = vmatpush.bf16.msrb.mxu2 %v460_v12 }
  0xe5   : > { %586 = vmatpush.bf16.msrb.mxu3 %v461_v15  ;;  %501 = vmatpush.bf16.msrb.mxu0 %v450_v16 }
  0xe6   : > { %530 = vmatpush.bf16.msrb.mxu1 %v451_v28 }
  0xe8   : > { %558 = vmatpush.bf16.msrb.mxu2 %v456_v32 }
  0xe9   : > { %587 = vmatpush.bf16.msrb.mxu3 %v457_v21  ;;  %502 = vmatpush.bf16.msrb.mxu0 %v446_v36 }
  0xea   : > { %531 = vmatpush.bf16.msrb.mxu1 %v447_v37 }
  0xec   : > { %559 = vmatpush.bf16.msrb.mxu2 %v452_v35  ;;  %924 = vmatmul.msk.bf16.vlgmr.msrb.gmra.mxu0 %vm482_vm1, %v951_v38 }
  0xed   : > { %588 = vmatpush.bf16.msrb.mxu3 %v453_v41  ;;  %928 = vmatmul.msk.bf16.vlgmr.msrb.gmra.mxu1 %vm482_vm1, %v951_v38 }
  0xf0   : > { %560 = vmatpush.bf16.msrb.mxu2 %v448_v26 }
  0xf1   : > { %589 = vmatpush.bf16.msrb.mxu3 %v449_v43 }
  0xf3   : > { %932 = vmatmul.msk.bf16.vlgmr.msrb.gmra.mxu2 %vm482_vm1, %v951_v38 }
  0xf4   : > { %936 = vmatmul.msk.bf16.vlgmr.msrb.gmra.mxu3 %vm482_vm1, %v951_v38 }
  0xfc   : > { %925 = vmatmul.msk.bf16.gmra.mxu0 %vm482_vm1, %v952_v22 }
  0xfd   : > { %929 = vmatmul.msk.bf16.gmra.mxu1 %vm482_vm1, %v952_v22 }
 0x103   : > { %933 = vmatmul.msk.bf16.gmra.mxu2 %vm482_vm1, %v952_v22 }
 0x104   : > { %937 = vmatmul.msk.bf16.gmra.mxu3 %vm482_vm1, %v952_v22 }
 0x10c   : > { %926 = vmatmul.msk.bf16.gmra.mxu0 %vm482_vm1, %v953_v46 }
 0x10d   : > { %930 = vmatmul.msk.bf16.gmra.mxu1 %vm482_vm1, %v953_v46 }
 0x113   : > { %934 = vmatmul.msk.bf16.gmra.mxu2 %vm482_vm1, %v953_v46 }
 0x114   : > { %938 = vmatmul.msk.bf16.gmra.mxu3 %vm482_vm1, %v953_v46 }
 0x11c   : > { %927 = vmatmul.msk.bf16.gmra.mxu0 %vm482_vm1, %v954_v48  ;;  %v659_v12 = vpop.permute.xlu0 %658 }
 0x11d   : > { %931 = vmatmul.msk.bf16.gmra.mxu1 %vm482_vm1, %v954_v48 }
 0x123   : > { %935 = vmatmul.msk.bf16.gmra.mxu2 %vm482_vm1, %v954_v48 }
 0x124   : > { %939 = vmatmul.msk.bf16.gmra.mxu3 %vm482_vm1, %v954_v48 }
 0x12d   : > { %v1208_v7 = vpop.permute.xlu2 %673 }
 0x133   : > { %v1224_v23 = vpop.permute.xlu0 %683 }
 0x135   : > { %v1219_v30 = vpop.permute.xlu2 %678 }
 0x13c   : > { %v1204_v3 = vpop.permute.xlu1 %663 }
 0x144   : > { %v1214_v20 = vpop.permute.xlu1 %668 }
 0x169   : > { %v504_v49 = vpop.f32.mrf.mxu0 }
 0x16a   : > { %v533_v50 = vpop.f32.mrf.mxu1  ;;  %v611_v10 = vmax.f32 %v504_v49, 0.0 }
 0x16b   : > { %v612_v8 = vmax.f32 %v533_v50, 0.0 }
 0x16c   : > { %v691_v28 = vmul.f32 %v654_v1, %v611_v10 }
 0x16d   : > { %v692_v17 = vmul.f32 %v654_v1, %v612_v8 }
 0x171   : > { %v506_v51 = vpop.f32.mrf.mxu0 }
 0x172   : > { %v535_v52 = vpop.f32.mrf.mxu1  ;;  %v615_v11 = vmax.f32 %v506_v51, 0.0 }
 0x173   : > { %v616_v9 = vmax.f32 %v535_v52, 0.0 }
 0x174   : > { %v695_v29 = vmul.f32 %v659_v12, %v615_v11 }
 0x175   : > { %v696_v18 = vmul.f32 %v659_v12, %v616_v9 }
 0x176   : > { %v562_v53 = vpop.f32.mrf.mxu2  ;;  %v723_v40 = vadd.f32 %v695_v29, %v691_v28 }
 0x177   : > { %v1192_v54 = vpop.f32.mrf.mxu3  ;;  %v613_v25 = vmax.f32 %v562_v53, 0.0  ;;  %v736_v38 = vadd.f32 %v696_v18, %v692_v17 }
 0x178   : > { %v614_v41 = vmax.f32 %v1192_v54, 0.0 }
 0x179   : > { %v509_v55 = vpop.f32.mrf.mxu0  ;;  %v693_v45 = vmul.f32 %v654_v1, %v613_v25 }
 0x17a   : > { %v538_v56 = vpop.f32.mrf.mxu1  ;;  %v619_v19 = vmax.f32 %v509_v55, 0.0  ;;  %v694_v54 = vmul.f32 %v654_v1, %v614_v41 }
 0x17b   : > { %v620_v13 = vmax.f32 %v538_v56, 0.0 }
 0x17c   : > { %v699_v35 = vmul.f32 %v1204_v3, %v619_v19 }
 0x17d   : > { %v700_v24 = vmul.f32 %v1204_v3, %v620_v13  ;;  %v689_v13 = vpop.permute.xlu1 %688 }
 0x17e   : > { %v1194_v57 = vpop.f32.mrf.mxu2  ;;  %v724_v51 = vadd.f32 %v723_v40, %v699_v35 }
 0x17f   : > { %v1196_v58 = vpop.f32.mrf.mxu3  ;;  %v737_v26 = vadd.f32 %v736_v38, %v700_v24  ;;  %v617_v44 = vmax.f32 %v1194_v57, 0.0 }
 0x180   : > { %v618_v49 = vmax.f32 %v1196_v58, 0.0 }
 0x181   : > { %v511_v59 = vpop.f32.mrf.mxu0 }
 0x182   : > { %v540_v60 = vpop.f32.mrf.mxu1  ;;  %v623_v21 = vmax.f32 %v511_v59, 0.0 }
 0x183   : > { %v624_v15 = vmax.f32 %v540_v60, 0.0 }
 0x184   : > { %v703_v22 = vmul.f32 %v1214_v20, %v623_v21 }
 0x185   : > { %v704_v34 = vmul.f32 %v1214_v20, %v624_v15 }
 0x186   : > { %v1198_v61 = vpop.f32.mrf.mxu2  ;;  %v725_v60 = vadd.f32 %v724_v51, %v703_v22 }
 0x187   : > { %v1200_v62 = vpop.f32.mrf.mxu3  ;;  %v738_v47 = vadd.f32 %v737_v26, %v704_v34  ;;  %v621_v53 = vmax.f32 %v1198_v61, 0.0  ;;  %v698_v61 = vmul.f32 %v659_v12, %v618_v49 }
 0x188   : > { %v622_v57 = vmax.f32 %v1200_v62, 0.0 }
 0x189   : > { %v514_v63 = vpop.f32.mrf.mxu0  ;;  %v701_v62 = vmul.f32 %v1204_v3, %v621_v53  ;;  %v762_v25 = vadd.f32 %v698_v61, %v694_v54 }
 0x18a   : > { %v543_v0 = vpop.f32.mrf.mxu1  ;;  %v627_v39 = vmax.f32 %v514_v63, 0.0 }
 0x18b   : > { %v628_v32 = vmax.f32 %v543_v0, 0.0 }
 0x18c   : > { %v707_v50 = vmul.f32 %v1208_v7, %v627_v39 }
 0x18d   : > { %v708_v42 = vmul.f32 %v1208_v7, %v628_v32 }
 0x18e   : > { %v1202_v2 = vpop.f32.mrf.mxu2  ;;  %v726_v1 = vadd.f32 %v725_v60, %v707_v50 }
 0x18f   : > { %v1206_v4 = vpop.f32.mrf.mxu3  ;;  %v739_v55 = vadd.f32 %v738_v47, %v708_v42  ;;  %v625_v58 = vmax.f32 %v1202_v2, 0.0  ;;  %v702_v2 = vmul.f32 %v1204_v3, %v622_v57 }
 0x190   : > { %v626_v10 = vmax.f32 %v1206_v4, 0.0 }
 0x191   : > { %v516_v5 = vpop.f32.mrf.mxu0  ;;  %v763_v40 = vadd.f32 %v762_v25, %v702_v2 }
 0x192   : > { %v545_v6 = vpop.f32.mrf.mxu1  ;;  %v631_v27 = vmax.f32 %v516_v5, 0.0 }
 0x193   : > { %v632_v37 = vmax.f32 %v545_v6, 0.0  ;;  %v697_v6 = vmul.f32 %v659_v12, %v617_v44 }
 0x194   : > { %v711_v63 = vmul.f32 %v1219_v30, %v631_v27 }
 0x195   : > { %v712_v48 = vmul.f32 %v1219_v30, %v632_v37  ;;  %v749_v4 = vadd.f32 %v697_v6, %v693_v45 }
 0x196   : > { %v1210_v14 = vpop.f32.mrf.mxu2  ;;  %v727_v29 = vadd.f32 %v726_v1, %v711_v63 }
 0x197   : > { %v1212_v16 = vpop.f32.mrf.mxu3  ;;  %v740_v8 = vadd.f32 %v739_v55, %v712_v48  ;;  %v629_v15 = vmax.f32 %v1210_v14, 0.0  ;;  %v706_v14 = vmul.f32 %v1214_v20, %v626_v10 }
 0x198   : > { %v630_v19 = vmax.f32 %v1212_v16, 0.0  ;;  %v750_v16 = vadd.f32 %v749_v4, %v701_v62 }
 0x199   : > { %v519_v33 = vpop.f32.mrf.mxu0  ;;  %v709_v38 = vmul.f32 %v1208_v7, %v629_v15  ;;  %v764_v26 = vadd.f32 %v763_v40, %v706_v14 }
 0x19a   : > { %v548_v36 = vpop.f32.mrf.mxu1  ;;  %v635_v52 = vmax.f32 %v519_v33, 0.0  ;;  %v705_v33 = vmul.f32 %v1214_v20, %v625_v58  ;;  %v710_v3 = vmul.f32 %v1208_v7, %v630_v19 }
 0x19b   : > { %v636_v31 = vmax.f32 %v548_v36, 0.0 }
 0x19c   : > { %v715_v11 = vmul.f32 %v1224_v23, %v635_v52  ;;  %v751_v42 = vadd.f32 %v750_v16, %v705_v33  ;;  %v765_v44 = vadd.f32 %v764_v26, %v710_v3 }
 0x19d   : > { %v716_v56 = vmul.f32 %v1224_v23, %v636_v31 }
 0x19e   : > { %v574_v43 = vpop.f32.mrf.mxu2  ;;  %v728_v37 = vadd.f32 %v727_v29, %v715_v11  ;;  %v752_v22 = vadd.f32 %v751_v42, %v709_v38 }
 0x19f   : > { %v603_v46 = vpop.f32.mrf.mxu3  ;;  %v741_v17 = vadd.f32 %v740_v8, %v716_v56  ;;  %v633_v24 = vmax.f32 %v574_v43, 0.0 }
 0x1a0   : > { %v634_v36 = vmax.f32 %v603_v46, 0.0 }
 0x1a1   : > { %v521_v59 = vpop.f32.mrf.mxu0  ;;  %v713_v31 = vmul.f32 %v1219_v30, %v633_v24 }
 0x1a2   : > { %v550_v0 = vpop.f32.mrf.mxu1  ;;  %v639_v5 = vmax.f32 %v521_v59, 0.0  ;;  %v714_v43 = vmul.f32 %v1219_v30, %v634_v36 }
 0x1a3   : > { %v640_v9 = vmax.f32 %v550_v0, 0.0  ;;  %v753_v48 = vadd.f32 %v752_v22, %v713_v31 }
 0x1a4   : > { %v719_v32 = vmul.f32 %v689_v13, %v639_v5  ;;  %v766_v50 = vadd.f32 %v765_v44, %v714_v43 }
 0x1a5   : > { %v720_v18 = vmul.f32 %v689_v13, %v640_v9 }
 0x1a6   : > { %v577_v28 = vpop.f32.mrf.mxu2  ;;  %v729_v41 = vadd.f32 %v728_v37, %v719_v32 }
 0x1a7   : > { %v606_v12 = vpop.f32.mrf.mxu3  ;;  %v742_v21 = vadd.f32 %v741_v17, %v720_v18  ;;  %v637_v34 = vmax.f32 %v577_v28, 0.0  ;;  %v789_v18 = vlaneseq }
 0x1a8   : > { %v638_v35 = vmax.f32 %v606_v12, 0.0  ;;  %v730_v47 = vrot.slane %v729_v41, 4 }
 0x1a9   : > { %v743_v39 = vrot.slane %v742_v21, 4  ;;  %v717_v20 = vmul.f32 %v1224_v23, %v637_v34  ;;  %vm791_vm5 = vcmp.lt.s32.totalorder %v789_v18, 512 }
 0x1aa   : > { %v718_v45 = vmul.f32 %v1224_v23, %v638_v35  ;;  %v731_v56 = vadd.f32 %v730_v47, %v729_v41 }
 0x1ab   : > { %v744_v27 = vadd.f32 %v743_v39, %v742_v21  ;;  %v754_v53 = vadd.f32 %v753_v48, %v717_v20 }
 0x1ac   : > { %v767_v55 = vadd.f32 %v766_v50, %v718_v45  ;;  %v732_v23 = vrot.slane %v731_v56, 2 }
 0x1ad   : > { %v745_v52 = vrot.slane %v744_v27, 2 }
 0x1ae   : > { %v579_v46 = vpop.f32.mrf.mxu2  ;;  %v733_v10 = vadd.f32 %v732_v23, %v731_v56 }
 0x1af   : > { %v641_v7 = vmax.f32 %v579_v46, 0.0  ;;  %v608_v49 = vpop.f32.mrf.mxu3  ;;  %v746_v57 = vadd.f32 %v745_v52, %v744_v27 }
 0x1b0   : > { %v642_v51 = vmax.f32 %v608_v49, 0.0  ;;  %v734_v62 = vrot.slane %v733_v10, 1 }
 0x1b1   : > { %v721_v54 = vmul.f32 %v689_v13, %v641_v7  ;;  %v747_v58 = vrot.slane %v746_v57, 1 }
 0x1b2   : > { %v722_v30 = vmul.f32 %v689_v13, %v642_v51  ;;  %v735_v32 = vadd.f32 %v734_v62, %v733_v10 }
 0x1b3   : > { %v755_v59 = vadd.f32 %v754_v53, %v721_v54  ;;  %v748_v1 = vadd.f32 %v747_v58, %v746_v57 }
 0x1b4   : > { %v768_v60 = vadd.f32 %v767_v55, %v722_v30 }
 0x1b5   : > { %v756_v63 = vrot.slane %v755_v59, 4  ;;  %v779_v2 = vrot.slane %v748_v1, 7 }
 0x1b6   : > { %v769_v0 = vrot.slane %v768_v60, 4 }
 0x1b7   : > { %v757_v5 = vadd.f32 %v756_v63, %v755_v59  ;;  %v783_v4 = vsel %vm782_vm3, %v735_v32, %v779_v2 }
 0x1b8   : > { %v770_v6 = vadd.f32 %v769_v0, %v768_v60 }
 0x1b9   : > { %v758_v8 = vrot.slane %v757_v5, 2 }
 0x1ba   : > { %v771_v9 = vrot.slane %v770_v6, 2 }
 0x1bb   : > { %v759_v61 = vadd.f32 %v758_v8, %v757_v5 }
 0x1bc   : > { %v772_v11 = vadd.f32 %v771_v9, %v770_v6 }
 0x1bd   : > { %v760_v13 = vrot.slane %v759_v61, 1 }
 0x1be   : > { %v773_v15 = vrot.slane %v772_v11, 1 }
 0x1bf   : > { %v761_v17 = vadd.f32 %v760_v13, %v759_v61 }
 0x1c0   : > { %v774_v19 = vadd.f32 %v773_v15, %v772_v11 }
 0x1c1   : > { %v780_v28 = vrot.slane %v761_v17, 6 }
 0x1c2   : > { %v781_v29 = vrot.slane %v774_v19, 5 }
 0x1c4   : > { %v785_v24 = vsel %vm784_vm2, %v780_v28, %v781_v29 }
 0x1c5   : > { %v787_v12 = vsel %vm786_vm4, %v783_v4, %v785_v24 }
 0x1c6   : > { %793 = vst.msk [vmem:[%s222_s24] sm:$0xf] %vm791_vm5, %v787_v12 }
 0x1c7 PF: > { %p11_p9 = scmp.ge.s32.totalorder %s1050_s19, 7   ;;  %s1269_s15 = smov %s1001_s16 }
 0x1c8   : > { %s1270_s16 = smov %s1059_s22  ;;  %s1271_s17 = smov %s1050_s19 }
 0x1c9   :  { %13 = sbr.rel (!%p11_p9) target bundleno = 2 (0x2), region = 94 }

</bundles_post_ra>
